<compile_context>
chip_gen: v5e
topology: v5e:2x2
jax: 0.10.0
libtpu: 0.0.40
codegen_flags: <defaults>
</compile_context>

<pallas_src>
import jax
import jax.numpy as jnp
from jax.experimental import pallas as pl
from jax.experimental.pallas import tpu as pltpu


_TILE_B_MAX = 4096  # rows per grid step; multiple of 128 (output lane dim)


def _leaky_relu(x, slope=0.01):
    return jnp.where(x > 0, x, slope * x)


def _softplus(x):
    # PyTorch softplus with threshold=20: identity above 20, log1p(exp(x)) below.
    return jnp.where(x > 20.0, x, jnp.log1p(jnp.exp(jnp.minimum(x, 20.0))))


def _round_up(n, m):
    return ((n + m - 1) // m) * m


def gaussian_reward_kernel(x_ref, w1_ref, b1_ref, w2_ref, b2_ref,
                           w3t_ref, b3_ref, out_ref):
    compute_dtype = w1_ref.dtype  # bf16 operands, f32 accumulation on the MXU

    # Cast x in-kernel (f32 HBM stream -> bf16 MXU operand); no wrapper pass.
    x = x_ref[...].astype(compute_dtype)

    # Layer 1: Linear + LeakyReLU
    h = jnp.dot(x, w1_ref[...], preferred_element_type=jnp.float32) + b1_ref[...]
    h = _leaky_relu(h)

    # Layer 2: Linear + LeakyReLU
    h = jnp.dot(h.astype(compute_dtype), w2_ref[...],
                preferred_element_type=jnp.float32) + b2_ref[...]
    h = _leaky_relu(h)

    # Head, computed transposed: (2, H) x (TILE_B, H)^T -> (2, TILE_B).
    # Lane-dense output tile; softplus only on the log-var row.
    out_t = jax.lax.dot_general(
        w3t_ref[...], h.astype(compute_dtype),
        dimension_numbers=(((1,), (1,)), ((), ())),
        preferred_element_type=jnp.float32) + b3_ref[...]

    out_ref[0:1, :] = out_t[0:1, :]
    out_ref[1:2, :] = _softplus(out_t[1:2, :])


def _choose_tile(batch):
    """Pick (tile_b, num_tiles): even split, >=2 steps when splittable, lane-aligned."""
    if batch < 256:
        return batch, 1  # single full-array tile (block == array dims)
    num_tiles = max(2, -(-batch // _TILE_B_MAX))
    tile_b = _round_up(-(-batch // num_tiles), 128)
    num_tiles = -(-batch // tile_b)
    return tile_b, num_tiles


def gaussian_reward_net(x, params):
    """x: (batch, D) f32. params: w1 (D,H), b1 (1,H), w2 (H,H), b2 (1,H),
    w3 (H,2), b3 (1,2). Returns (mu, sigma), each (batch, 1) f32."""
    batch, d = x.shape
    h = params["w1"].shape[1]

    # Weights are tiny and VMEM-resident; one-time bf16 cast in the wrapper is free.
    w1 = params["w1"].astype(jnp.bfloat16)
    w2 = params["w2"].astype(jnp.bfloat16)
    w3t = params["w3"].T.astype(jnp.bfloat16)                 # (2, H)
    b1 = params["b1"].astype(jnp.float32)                     # (1, H)
    b2 = params["b2"].astype(jnp.float32)                     # (1, H)
    b3 = params["b3"].reshape(2, 1).astype(jnp.float32)       # (2, 1)

    tile_b, num_tiles = _choose_tile(batch)

    const = lambda i: (0, 0)  # weights/biases: same block every step (resident)

    cost = pl.CostEstimate(
        flops=2 * batch * (d * h + h * h + 2 * h),
        transcendentals=2 * batch,
        bytes_accessed=(batch * d * x.dtype.itemsize            # x stream
                        + 2 * batch * 4                         # output
                        + (w1.size + w2.size + w3t.size) * 2    # bf16 weights
                        + (b1.size + b2.size + b3.size) * 4),   # f32 biases
    )

    out = pl.pallas_call(
        gaussian_reward_kernel,
        out_shape=jax.ShapeDtypeStruct((2, batch), jnp.float32),
        grid=(num_tiles,),
        in_specs=[
            pl.BlockSpec((tile_b, d), lambda i: (i, 0)),  # x: streamed per batch tile
            pl.BlockSpec((d, h), const),
            pl.BlockSpec((1, h), const),
            pl.BlockSpec((h, h), const),
            pl.BlockSpec((1, h), const),
            pl.BlockSpec((2, h), const),
            pl.BlockSpec((2, 1), const),
        ],
        out_specs=pl.BlockSpec((2, tile_b), lambda i: (0, i)),  # lane-dense output
        compiler_params=pltpu.CompilerParams(
            dimension_semantics=("parallel",)),  # shard batch tiles across TCs (v7x)
        cost_estimate=cost,
    )(x, w1, b1, w2, b2, w3t, b3)

    mu = out[0, :][:, None]
    sigma = out[1, :][:, None]
    return mu, sigma


def init_params(key, input_dim, hidden_dim):
    """PyTorch-default-style Linear init: uniform(-1/sqrt(fan_in), 1/sqrt(fan_in))."""
    ks = jax.random.split(key, 6)

    def lin(kw, kb, fan_in, fan_out):
        bound = 1.0 / jnp.sqrt(fan_in)
        w = jax.random.uniform(kw, (fan_in, fan_out), jnp.float32, -bound, bound)
        b = jax.random.uniform(kb, (1, fan_out), jnp.float32, -bound, bound)
        return w, b

    w1, b1 = lin(ks[0], ks[1], input_dim, hidden_dim)
    w2, b2 = lin(ks[2], ks[3], hidden_dim, hidden_dim)
    w3, b3 = lin(ks[4], ks[5], hidden_dim, 2)
    return {"w1": w1, "b1": b1, "w2": w2, "b2": b2, "w3": w3, "b3": b3}


def reference_forward(x, p):
    """Pure-JAX reference mirroring the kernel's bf16-operand / f32-accumulate math."""
    xb = x.astype(jnp.bfloat16)
    w1 = p["w1"].astype(jnp.bfloat16)
    w2 = p["w2"].astype(jnp.bfloat16)
    w3 = p["w3"].astype(jnp.bfloat16)
    h = _leaky_relu(jnp.dot(xb, w1, preferred_element_type=jnp.float32) + p["b1"])
    h = _leaky_relu(jnp.dot(h.astype(jnp.bfloat16), w2,
                            preferred_element_type=jnp.float32) + p["b2"])
    out = jnp.dot(h.astype(jnp.bfloat16), w3,
                  preferred_element_type=jnp.float32) + p["b3"]
    mu = out[:, 0:1]
    log_var = out[:, 1:2]
    sigma = _softplus(log_var)
    return mu, sigma


if __name__ == "__main__":
    key = jax.random.PRNGKey(0)
    k_x, k_p, k_x2 = jax.random.split(key, 3)

    input_dim, hidden_dim = 16, 32
    params = init_params(k_p, input_dim, hidden_dim)

    # Small batch: single full-array tile.
    batch = 8
    x = jax.random.normal(k_x, (batch, input_dim), jnp.float32)
    mu, sigma = gaussian_reward_net(x, params)
    jax.block_until_ready((mu, sigma))

    mu_ref, sigma_ref = reference_forward(x, params)
    assert mu.shape == (batch, 1) and sigma.shape == (batch, 1)
    assert jnp.allclose(mu, mu_ref, atol=2e-3, rtol=2e-3)
    assert jnp.allclose(sigma, sigma_ref, atol=2e-3, rtol=2e-3)
    assert bool(jnp.all(sigma > 0))

    # Larger batch: exercises multi-tile grid, even-split tiling, and the
    # masked partial last block (600 -> 2 tiles of 384, last one partial).
    batch2 = 600
    x2 = jax.random.normal(k_x2, (batch2, input_dim), jnp.float32)
    mu2, sigma2 = gaussian_reward_net(x2, params)
    jax.block_until_ready((mu2, sigma2))

    mu2_ref, sigma2_ref = reference_forward(x2, params)
    assert mu2.shape == (batch2, 1) and sigma2.shape == (batch2, 1)
    assert jnp.allclose(mu2, mu2_ref, atol=2e-3, rtol=2e-3)
    assert jnp.allclose(sigma2, sigma2_ref, atol=2e-3, rtol=2e-3)
    assert bool(jnp.all(sigma2 > 0))

    print("KERNEL_OK")
</pallas_src>

<mosaic_0001>
module attributes {stable_mosaic.version = 11 : i64} {
  func.func @gaussian_reward_kernel(%arg0: i32, %arg1: memref<8x16xf32, #tpu.memory_space<vmem>>, %arg2: memref<16x32xbf16, #tpu.memory_space<vmem>>, %arg3: memref<1x32xf32, #tpu.memory_space<vmem>>, %arg4: memref<32x32xbf16, #tpu.memory_space<vmem>>, %arg5: memref<1x32xf32, #tpu.memory_space<vmem>>, %arg6: memref<2x32xbf16, #tpu.memory_space<vmem>>, %arg7: memref<2x1xf32, #tpu.memory_space<vmem>>, %arg8: memref<2x8xf32, #tpu.memory_space<vmem>>) attributes {dimension_semantics = [#tpu.dimension_semantics<parallel>], iteration_bounds = array<i64: 1>, scalar_prefetch = 0 : i64, scratch_operands = 0 : i64, tpu.core_type = #tpu.core_type<tc>, window_params = [{transform_indices = @transform_0, window_bounds = array<i64: 8, 16>}, {pipeline_mode = #tpu.pipeline_mode<synchronous>, transform_indices = @transform_1, window_bounds = array<i64: 16, 32>}, {pipeline_mode = #tpu.pipeline_mode<synchronous>, transform_indices = @transform_2, window_bounds = array<i64: 1, 32>}, {pipeline_mode = #tpu.pipeline_mode<synchronous>, transform_indices = @transform_3, window_bounds = array<i64: 32, 32>}, {pipeline_mode = #tpu.pipeline_mode<synchronous>, transform_indices = @transform_4, window_bounds = array<i64: 1, 32>}, {pipeline_mode = #tpu.pipeline_mode<synchronous>, transform_indices = @transform_5, window_bounds = array<i64: 2, 32>}, {pipeline_mode = #tpu.pipeline_mode<synchronous>, transform_indices = @transform_6, window_bounds = array<i64: 2, 1>}, {transform_indices = @transform_7, window_bounds = array<i64: 2, 8>}]} {
    %c0 = arith.constant 0 : index
    %c0_0 = arith.constant 0 : index
    %0 = vector.load %arg1[%c0, %c0_0] : memref<8x16xf32, #tpu.memory_space<vmem>>, vector<8x16xf32>
    %1 = arith.truncf %0 : vector<8x16xf32> to vector<8x16xbf16>
    %c0_1 = arith.constant 0 : index
    %c0_2 = arith.constant 0 : index
    %2 = vector.load %arg2[%c0_1, %c0_2] : memref<16x32xbf16, #tpu.memory_space<vmem>>, vector<16x32xbf16>
    %cst = arith.constant dense<0.000000e+00> : vector<8x32xf32>
    %3 = tpu.matmul %1, %2, %cst {dimension_numbers = #tpu.dot_dimension_numbers<[1], [0], [0], [1], [0, 0, 1, 1], [], []>} : vector<8x16xbf16>, vector<16x32xbf16>, vector<8x32xf32> -> vector<8x32xf32>
    %c0_3 = arith.constant 0 : index
    %c0_4 = arith.constant 0 : index
    %4 = vector.load %arg3[%c0_3, %c0_4] : memref<1x32xf32, #tpu.memory_space<vmem>>, vector<1x32xf32>
    %5 = vector.broadcast %4 : vector<1x32xf32> to vector<8x32xf32>
    %6 = arith.addf %3, %5 : vector<8x32xf32>
    %cst_5 = arith.constant 0.000000e+00 : f32
    %7 = vector.broadcast %cst_5 : f32 to vector<8x32xf32>
    %8 = arith.cmpf ogt, %6, %7 : vector<8x32xf32>
    %cst_6 = arith.constant 0.00999999977 : f32
    %9 = vector.broadcast %cst_6 : f32 to vector<8x32xf32>
    %10 = arith.mulf %9, %6 : vector<8x32xf32>
    %11 = arith.select %8, %6, %10 : vector<8x32xi1>, vector<8x32xf32>
    %12 = arith.truncf %11 : vector<8x32xf32> to vector<8x32xbf16>
    %c0_7 = arith.constant 0 : index
    %c0_8 = arith.constant 0 : index
    %13 = vector.load %arg4[%c0_7, %c0_8] : memref<32x32xbf16, #tpu.memory_space<vmem>>, vector<32x32xbf16>
    %cst_9 = arith.constant dense<0.000000e+00> : vector<8x32xf32>
    %14 = tpu.matmul %12, %13, %cst_9 {dimension_numbers = #tpu.dot_dimension_numbers<[1], [0], [0], [1], [0, 0, 1, 1], [], []>} : vector<8x32xbf16>, vector<32x32xbf16>, vector<8x32xf32> -> vector<8x32xf32>
    %c0_10 = arith.constant 0 : index
    %c0_11 = arith.constant 0 : index
    %15 = vector.load %arg5[%c0_10, %c0_11] : memref<1x32xf32, #tpu.memory_space<vmem>>, vector<1x32xf32>
    %16 = vector.broadcast %15 : vector<1x32xf32> to vector<8x32xf32>
    %17 = arith.addf %14, %16 : vector<8x32xf32>
    %cst_12 = arith.constant 0.000000e+00 : f32
    %18 = vector.broadcast %cst_12 : f32 to vector<8x32xf32>
    %19 = arith.cmpf ogt, %17, %18 : vector<8x32xf32>
    %cst_13 = arith.constant 0.00999999977 : f32
    %20 = vector.broadcast %cst_13 : f32 to vector<8x32xf32>
    %21 = arith.mulf %20, %17 : vector<8x32xf32>
    %22 = arith.select %19, %17, %21 : vector<8x32xi1>, vector<8x32xf32>
    %c0_14 = arith.constant 0 : index
    %c0_15 = arith.constant 0 : index
    %23 = vector.load %arg6[%c0_14, %c0_15] : memref<2x32xbf16, #tpu.memory_space<vmem>>, vector<2x32xbf16>
    %24 = arith.truncf %22 : vector<8x32xf32> to vector<8x32xbf16>
    %cst_16 = arith.constant dense<0.000000e+00> : vector<2x8xf32>
    %25 = tpu.matmul %23, %24, %cst_16 {dimension_numbers = #tpu.dot_dimension_numbers<[1], [1], [0], [0], [0, 0, 1, 0], [], []>} : vector<2x32xbf16>, vector<8x32xbf16>, vector<2x8xf32> -> vector<2x8xf32>
    %c0_17 = arith.constant 0 : index
    %c0_18 = arith.constant 0 : index
    %26 = vector.load %arg7[%c0_17, %c0_18] : memref<2x1xf32, #tpu.memory_space<vmem>>, vector<2x1xf32>
    %27 = vector.broadcast %26 : vector<2x1xf32> to vector<2x8xf32>
    %28 = arith.addf %25, %27 : vector<2x8xf32>
    %29 = vector.extract_strided_slice %28 {offsets = [0, 0], sizes = [1, 8], strides = [1, 1]} : vector<2x8xf32> to vector<1x8xf32>
    %c0_19 = arith.constant 0 : index
    %c0_20 = arith.constant 0 : index
    %30 = vector.load %arg8[%c0_19, %c0_20] : memref<2x8xf32, #tpu.memory_space<vmem>>, vector<1x8xf32>
    tpu.vector_store %arg8[%c0_19, %c0_20], %29 {strides = array<i32>} : memref<2x8xf32, #tpu.memory_space<vmem>>, vector<1x8xf32>,
    %31 = vector.extract_strided_slice %28 {offsets = [1, 0], sizes = [1, 8], strides = [1, 1]} : vector<2x8xf32> to vector<1x8xf32>
    %cst_21 = arith.constant 2.000000e+01 : f32
    %32 = vector.broadcast %cst_21 : f32 to vector<1x8xf32>
    %33 = arith.cmpf ogt, %31, %32 : vector<1x8xf32>
    %cst_22 = arith.constant 2.000000e+01 : f32
    %34 = vector.broadcast %cst_22 : f32 to vector<1x8xf32>
    %35 = arith.minimumf %31, %34 : vector<1x8xf32>
    %36 = math.exp %35 : vector<1x8xf32>
    %37 = math.log1p %36 : vector<1x8xf32>
    %38 = arith.select %33, %31, %37 : vector<1x8xi1>, vector<1x8xf32>
    %c1 = arith.constant 1 : index
    %c0_23 = arith.constant 0 : index
    %39 = vector.load %arg8[%c1, %c0_23] : memref<2x8xf32, #tpu.memory_space<vmem>>, vector<1x8xf32>
    tpu.vector_store %arg8[%c1, %c0_23], %38 {strides = array<i32>} : memref<2x8xf32, #tpu.memory_space<vmem>>, vector<1x8xf32>,
    return
  }
  func.func @transform_0(%arg0: i32) -> (i32, i32) {
    %c0_i32 = arith.constant 0 : i32
    %c0_i32_0 = arith.constant 0 : i32
    return %arg0, %c0_i32 : i32, i32
  }
  func.func @transform_1(%arg0: i32) -> (i32, i32) {
    %c0_i32 = arith.constant 0 : i32
    %c0_i32_0 = arith.constant 0 : i32
    %c0_i32_1 = arith.constant 0 : i32
    return %c0_i32, %c0_i32_0 : i32, i32
  }
  func.func @transform_2(%arg0: i32) -> (i32, i32) {
    %c0_i32 = arith.constant 0 : i32
    %c0_i32_0 = arith.constant 0 : i32
    %c0_i32_1 = arith.constant 0 : i32
    return %c0_i32, %c0_i32_0 : i32, i32
  }
  func.func @transform_3(%arg0: i32) -> (i32, i32) {
    %c0_i32 = arith.constant 0 : i32
    %c0_i32_0 = arith.constant 0 : i32
    %c0_i32_1 = arith.constant 0 : i32
    return %c0_i32, %c0_i32_0 : i32, i32
  }
  func.func @transform_4(%arg0: i32) -> (i32, i32) {
    %c0_i32 = arith.constant 0 : i32
    %c0_i32_0 = arith.constant 0 : i32
    %c0_i32_1 = arith.constant 0 : i32
    return %c0_i32, %c0_i32_0 : i32, i32
  }
  func.func @transform_5(%arg0: i32) -> (i32, i32) {
    %c0_i32 = arith.constant 0 : i32
    %c0_i32_0 = arith.constant 0 : i32
    %c0_i32_1 = arith.constant 0 : i32
    return %c0_i32, %c0_i32_0 : i32, i32
  }
  func.func @transform_6(%arg0: i32) -> (i32, i32) {
    %c0_i32 = arith.constant 0 : i32
    %c0_i32_0 = arith.constant 0 : i32
    %c0_i32_1 = arith.constant 0 : i32
    return %c0_i32, %c0_i32_0 : i32, i32
  }
  func.func @transform_7(%arg0: i32) -> (i32, i32) {
    %c0_i32 = arith.constant 0 : i32
    %c0_i32_0 = arith.constant 0 : i32
    return %c0_i32, %arg0 : i32, i32
  }
}

</mosaic_0001>

<bundles_post_ra>
// kernel: tpu_custom_call.1
= control target key start
LH: loop header
LB: loop body
LE: loop exit
PB: predicated region body
PF: predicated region fallthrough
CT: control target
= control target key end

     0   :  { %12 = vsyncpa [#allocation3], 0  ;;  %s419_s0 = inlined_call_operand.hbm [shape: f32[8,16], index: 0, kind: input, shape index: {}]   ;;  %s420_s1 = inlined_call_operand.hbm [shape: bf16[16,32], index: 1, kind: input, shape index: {}]   ;;  %s421_s2 = inlined_call_operand.vmem [shape: f32[1,32], index: 2, kind: input, shape index: {}]   ;;  %s422_s3 = inlined_call_operand.hbm [shape: bf16[32,32], index: 3, kind: input, shape index: {}]   ;;  %s423_s4 = inlined_call_operand.vmem [shape: f32[1,32], index: 4, kind: input, shape index: {}]   ;;  %s424_s5 = inlined_call_operand.vmem [shape: bf16[2,32], index: 5, kind: input, shape index: {}]   ;;  %s425_s6 = inlined_call_operand.vmem [shape: f32[2,1], index: 6, kind: input, shape index: {}]   ;;  %s426_s7 = inlined_call_operand.hbm [shape: f32[2,8], index: 7, kind: output, shape index: {}]  }
   0x1   :  { %13 = vsyncpa [#allocation6], 0  ;;  %s30_s26 = sshll.u32 %s420_s1, 4  ;;  %s31_s26 = int_to_ptr.hbm [resolvable:$true] %s30_s26 }
   0x2   :  { %14 = vsyncpa [#allocation4], 0  ;;  %s345_s27 = smov [#allocation5]   ;;  %s20_s8 = sshll.u32 %s419_s0, 4  ;;  %s21_s8 = int_to_ptr.hbm [resolvable:$true] %s20_s8 }
   0x3   :  { %s32_s28 = sshll.u32 %s345_s27, 4  ;;  %s346_s9 = smov 64   ;;  %s33_s28 = int_to_ptr.vmem [resolvable:$true] %s32_s28 }
   0x4   :  { %s347_s10 = smov 4   ;;  %s348_s11 = smov [#allocation2]  }
   0x5   :  { %38 = dma.hbm_to_vmem [thread:$0]  %s31_s26, 128, %s33_s28, [#allocation6], %s346_s9, %s346_s9, %s347_s10  }
   0x6   :  { %s22_s12 = sshll.u32 %s348_s11, 4  ;;  %s45_s15 = sshll.u32 %s422_s3, 4  ;;  %s23_s12 = int_to_ptr.vmem [resolvable:$true] %s22_s12  ;;  %s46_s15 = int_to_ptr.hbm [resolvable:$true] %s45_s15 }
   0x7   :  { %25 = dma.hbm_to_vmem [thread:$0]  %s21_s8, 128, %s23_s12, [#allocation3]  }
   0x8   :  { %s349_s1 = smov [#allocation7]  }
   0x9   :  { %s47_s16 = sshll.u32 %s349_s1, 4  ;;  %s48_s16 = int_to_ptr.vmem [resolvable:$true] %s47_s16 }
   0xa   :  { %53 = dma.hbm_to_vmem [thread:$0]  %s46_s15, 256, %s48_s16, [#allocation6], %s346_s9, %s346_s9, %s347_s10  }
   0xb   :  { %339 = dma.done.wait [#allocation3], 128  }
   0xc   :  { %340 = vsyncadd [#allocation3], 4294967168 }
   0xd   :  { %341 = dma.done.wait [#allocation6], 384  }
   0xe   :  { %342 = vsyncadd [#allocation6], 4294966912  ;;  %v226_v0 = vld [vmem:[#allocation5] sm:$0xff]  ;;  %v73_v1 = vld [vmem:[#allocation2] sm:$0xff]  ;;  %vm87_vm0 = vcmask 130048   ;;  %vm128_vm2 = vcmask 261120  }
   0xf   :  { %v74_v2 = vpack.c.bf16 %v73_v1, %v73_v1  ;;  %98 = vmatpush.bf16.msra.mxu0 %v226_v0  ;;  %v228_v3 = vld [vmem:[#allocation7 + $0x8] sm:$0xff]  ;;  %v227_v4 = vld [vmem:[#allocation7] sm:$0xff]  ;;  %v237_v5 = vld [vmem:[%s421_s2] ss:$0 sm:$0xff]  ;;  %v350_v13 = vmov 0   ;;  %vm175_vm4 = vcmask 57344  }
  0x10   :  { %138 = vmatpush.bf16.msra.mxu1 %v228_v3  ;;  %v150_v12 = vld [vmem:[%s425_s6] sm:$0x3]  ;;  %236 = vset.pattern.permute.xlu0 %v350_v13  ;;  %s200_s23 = sshll.u32 %s426_s7, 4  ;;  %vm191_vm6 = vcmask 58369   ;;  %s201_s23 = int_to_ptr.hbm [resolvable:$true] %s200_s23 }
  0x11   :  { %153 = vperm.xlu0 %236, %v150_v12   ;;  %v238_v14 = vld [vmem:[%s423_s4] ss:$0 sm:$0xff]  ;;  %s351_s4 = smov [#allocation8]  }
  0x12   :  { %215 = vmatmul.msk.bf16.vlgmr.msra.gmra.mxu0 %vm87_vm0, %v74_v2  ;;  %v148_v22 = vld [vmem:[%s424_s5] sm:$0x1]  ;;  %s198_s5 = sshll.u32 %s351_s4, 4  ;;  %s199_s5 = int_to_ptr.vmem [resolvable:$true] %s198_s5 }
  0x14   :  { %139 = vmatpush.bf16.msra.mxu1 %v227_v4 }
  0x83   :  { %v154_v23 = vpop.permute.xlu0 %153 }
  0x8f   :  { %v100_v6 = vpop.f32.mrf.mxu0 }
  0x90   :  { %v101_v7 = vadd.f32 %v237_v5, %v100_v6 }
  0x92   :  { %vm104_vm1 = vcmp.gt.f32.partialorder %v101_v7, 0.0  ;;  %v105_v8 = vmul.f32 0.01, %v101_v7 }
  0x94   :  { %v106_v9 = vsel %vm104_vm1, %v101_v7, %v105_v8 }
  0x95   :  { %v107_v10 = vpack.c.bf16 %v106_v9, %v106_v9 }
  0x97   :  { %v102_v11 = vpop.f32.mrf.mxu0  ;;  %224 = vmatmul.msk.bf16.vlgmr.msra.gmra.mxu1 %vm128_vm2, %v107_v10 }
 0x114   :  { %v141_v15 = vpop.f32.mrf.mxu1 }
 0x115   :  { %v142_v16 = vadd.f32 %v238_v14, %v141_v15 }
 0x117   :  { %v146_v17 = vmul.f32 0.01, %v142_v16  ;;  %vm145_vm3 = vcmp.gt.f32.partialorder %v142_v16, 0.0 }
 0x119   :  { %v147_v18 = vsel %vm145_vm3, %v142_v16, %v146_v17 }
 0x11a   :  { %v149_v19 = vpack.c.bf16 %v147_v18, %v147_v18 }
 0x11c   :  { %v143_v20 = vpop.f32.mrf.mxu1  ;;  %v160_v21 = vsel %vm128_vm2, %v149_v19, 0 }
 0x11d   :  { %169 = vmatpush.bf16.xpose.msra.mxu2 %v160_v21 }
 0x124   :  { %225 = vmatmul.msk.bf16.vlgmr.msra.gmra.mxu2 %vm128_vm2, %v148_v22 }
 0x1a7   :  { %v171_v24 = vpop.f32.mrf.mxu2 }
 0x1a8   :  { %v172_v25 = vadd.f32 %v171_v24, %v154_v23 }
 0x1aa   :  { %v178_v26 = vmin.f32 %v172_v25, 20.0  ;;  %176 = vst.msk [vmem:[#allocation8] sm:$0x1] %vm175_vm4, %v172_v25  ;;  %vm177_vm7 = vcmp.gt.f32.partialorder %v172_v25, 20.0 }
 0x1ac   :  { %v179_v27 = vmul.f32 1.442695, %v178_v26 }
 0x1ae   :  { %239 = vpow2.f32 %v179_v27 }
 0x1af   :  { %v173_v28 = vpop.f32.mrf.mxu2 }
 0x1b4   :  { %v240_v29 = vpop.eup %239 }
 0x1b5   :  { %v181_v30 = vadd.f32 1.0, %v240_v29  ;;  %v184_v31 = vmul.f32 -0.5, %v240_v29  ;;  %v187_v33 = vand.u32 2147483647, %v240_v29 }
 0x1b7   :  { %241 = vlog2.f32 %v181_v30  ;;  %v185_v32 = vadd.f32 1.0, %v184_v31  ;;  %vm188_vm5 = vcmp.lt.f32.partialorder %v187_v33, 0.0004427343 }
 0x1b9   :  { %v186_v36 = vmul.f32 %v240_v29, %v185_v32 }
 0x1bd   :  { %v242_v34 = vpop.eup %241 }
 0x1be   :  { %v183_v35 = vmul.f32 0.6931472, %v242_v34 }
 0x1c0   :  { %v189_v37 = vsel %vm188_vm5, %v186_v36, %v183_v35 }
 0x1c1   :  { %v190_v38 = vsel %vm177_vm7, %v172_v25, %v189_v37 }
 0x1c2   :  { %192 = vst.msk [vmem:[#allocation8] sm:$0x2] %vm191_vm6, %v190_v38 }
 0x1c3   :  { %203 = dma.vmem_to_hbm [thread:$0]  %s199_s5, 32, %s201_s23, [#allocation4]  }
 0x1c4   :  { %343 = dma.done.wait [#allocation4], 32  }
 0x1c5   :  { %344 = vsyncadd [#allocation4], 4294967264 }
 0x1c6   :  { %208 = vsyncpa [#allocation3], 1 }
 0x1c7   :  { %209 = vsyncpa [#allocation6], 1 }
 0x1c8   :  { %210 = vsyncpa [#allocation4], 1 }

</bundles_post_ra>
